<compile_context>
chip_gen: v7x
topology: tpu7x:2x2x1
jax: 0.10.0
libtpu: 0.0.40
codegen_flags: <defaults>
</compile_context>

<pallas_src>
import functools

import jax
import jax.numpy as jnp
import numpy as np
from jax import lax
from jax.experimental import pallas as pl
from jax.experimental.pallas import tpu as pltpu


def _round_up(a, m):
    return ((a + m - 1) // m) * m


def make_rise_kernel(inv_np1):
    inv_np1 = float(inv_np1)

    def kernel(masks_ref, xT_ref, w_ref, b_ref, sal_ref, acc_ref):
        @pl.when(pl.program_id(0) == 0)
        def _init():
            acc_ref[...] = jnp.zeros_like(acc_ref)

        masks = masks_ref[...]                                        # (tN, HW) bf16
        # model(stack): GAP over spatial of (mask_i * x) -> Linear(C->CL).
        # 1/HW is pre-folded into xT on the host.
        feats = jnp.dot(masks, xT_ref[...],
                        preferred_element_type=jnp.float32)           # (tN, C) f32
        p = jnp.dot(feats, w_ref[...],
                    preferred_element_type=jnp.float32) + b_ref[...]  # (tN, CL) f32

        # sal partial: contract over the N axis without materializing p.T.
        acc_ref[...] += lax.dot_general(
            p.astype(masks.dtype), masks,
            dimension_numbers=(((0,), (0,)), ((), ())),
            preferred_element_type=jnp.float32)                       # (CL, HW) f32

        @pl.when(pl.program_id(0) == pl.num_programs(0) - 1)
        def _finalize():
            sal_ref[...] = acc_ref[...] * inv_np1

    return kernel


@functools.partial(jax.jit, static_argnames=("p1", "tile_n"))
def rise_forward(x, masks, w, b, p1, tile_n=128):
    """x: (1, C, H, W) NCHW; masks: (N, 1, H, W); w: (C, CL); b: (CL,)."""
    _, C, H, W = x.shape
    N = masks.shape[0]
    HW = H * W
    CL = w.shape[1]

    # --- tile / padding over N (zero-padded mask rows contribute nothing to sal) ---
    tile_n = max(8, (min(int(tile_n), _round_up(N, 8)) // 8) * 8)
    n_pad = _round_up(N, tile_n)
    grid_n = n_pad // tile_n

    masks_flat = masks.reshape(N, HW).astype(jnp.bfloat16)            # (N, HW) bf16
    if n_pad != N:
        masks_flat = jnp.pad(masks_flat, ((0, n_pad - N), (0, 0)))
    # Fold GAP normalization (1/HW) into the image slab; keep HW on the row axis
    # here so the classifier matmul contracts it.
    xT = (x.reshape(C, HW).T.astype(jnp.float32) / float(HW)).astype(jnp.bfloat16)
    w32 = w.astype(jnp.float32)                                       # (C, CL)
    b2 = b.reshape(1, CL).astype(jnp.float32)                         # (1, CL)

    inv_np1 = 1.0 / (float(N) * float(p1))

    # --- VMEM / cost bookkeeping ---
    est_vmem = (2 * tile_n * HW * 2        # double-buffered masks tiles (bf16)
                + HW * C * 2               # xT (bf16)
                + C * CL * 4 + CL * 4      # w, b (f32)
                + CL * HW * 4              # acc scratch (f32)
                + 2 * CL * HW * 4)         # output buffers (f32)
    vmem_limit = int(min(64 * 1024 * 1024, max(32 * 1024 * 1024, 4 * est_vmem)))

    cost = pl.CostEstimate(
        flops=2 * n_pad * HW * (C + CL),
        transcendentals=0,
        bytes_accessed=int(n_pad * HW * 2 + HW * C * 2 + C * CL * 4
                           + CL * 4 + CL * HW * 4),
    )

    sal = pl.pallas_call(
        make_rise_kernel(inv_np1),
        out_shape=jax.ShapeDtypeStruct((CL, HW), jnp.float32),
        grid_spec=pltpu.PrefetchScalarGridSpec(
            num_scalar_prefetch=0,
            grid=(grid_n,),
            in_specs=[
                pl.BlockSpec((tile_n, HW), lambda i: (i, 0)),   # masks tile (streamed)
                pl.BlockSpec((HW, C), lambda i: (0, 0)),        # image (resident)
                pl.BlockSpec((C, CL), lambda i: (0, 0)),        # classifier weight
                pl.BlockSpec((1, CL), lambda i: (0, 0)),        # classifier bias
            ],
            out_specs=pl.BlockSpec((CL, HW), lambda i: (0, 0)),  # lane-dense output
            scratch_shapes=[pltpu.VMEM((CL, HW), jnp.float32)],  # sal accumulator
        ),
        compiler_params=pltpu.CompilerParams(
            dimension_semantics=("arbitrary",),
            vmem_limit_bytes=vmem_limit,
        ),
        cost_estimate=cost,
    )(masks_flat, xT, w32, b2)

    return sal.reshape(CL, H, W)


def rise_reference(x, masks, w, b, p1):
    """Pure-JAX f32 reference mirroring the PyTorch forward literally."""
    _, C, H, W = x.shape
    N = masks.shape[0]
    stack = masks * x                                            # (N, C, H, W)
    feats = stack.mean(axis=(2, 3))                              # model: GAP
    p = feats @ w + b                                            # model: Linear
    sal = p.T @ masks.reshape(N, H * W)                          # (CL, H*W)
    sal = sal.reshape(w.shape[1], H, W) / N / p1
    return sal


if __name__ == "__main__":
    # Small, deterministic problem sizes. N is deliberately NOT a multiple of the
    # tile so the zero-padding path is exercised, and tile_n < N so the grid runs
    # several accumulation steps.
    N, C, H, W, CL = 60, 4, 16, 16, 10
    p1 = 0.5

    key = jax.random.PRNGKey(0)
    kx, km, kw, kb = jax.random.split(key, 4)

    x = jax.random.normal(kx, (1, C, H, W), dtype=jnp.float32)
    # TODO(synk): original generate_masks uses skimage bilinear resize of random
    # binary grids; here masks are deterministic random values in [0,1].
    masks = jax.random.uniform(km, (N, 1, H, W), dtype=jnp.float32)
    # Deterministic synthetic classifier parameters (GAP + Linear C->CL).
    w = jax.random.normal(kw, (C, CL), dtype=jnp.float32) * 0.1
    b = jax.random.normal(kb, (CL,), dtype=jnp.float32) * 0.01

    sal = rise_forward(x, masks, w, b, p1, tile_n=16)
    sal = jax.block_until_ready(sal)

    sal_ref = jax.block_until_ready(rise_reference(x, masks, w, b, p1))
    # bf16 inputs (masks / image / p) with f32 accumulation -> loosened tolerance.
    np.testing.assert_allclose(np.asarray(sal), np.asarray(sal_ref),
                               rtol=2e-2, atol=1e-3)
    print("KERNEL_OK")
</pallas_src>

<mosaic_0001>
module attributes {stable_mosaic.version = 11 : i64} {
  func.func @kernel(%arg0: i32, %arg1: memref<16x256xbf16, #tpu.memory_space<vmem>>, %arg2: memref<256x4xbf16, #tpu.memory_space<vmem>>, %arg3: memref<4x10xf32, #tpu.memory_space<vmem>>, %arg4: memref<1x10xf32, #tpu.memory_space<vmem>>, %arg5: memref<10x256xf32, #tpu.memory_space<vmem>>, %arg6: memref<10x256xf32, #tpu.memory_space<vmem>>) attributes {dimension_semantics = [#tpu.dimension_semantics<arbitrary>], iteration_bounds = array<i64: 4>, scalar_prefetch = 0 : i64, scratch_operands = 1 : i64, tpu.core_type = #tpu.core_type<tc>, window_params = [{transform_indices = @transform_0, window_bounds = array<i64: 16, 256>}, {pipeline_mode = #tpu.pipeline_mode<synchronous>, transform_indices = @transform_1, window_bounds = array<i64: 256, 4>}, {pipeline_mode = #tpu.pipeline_mode<synchronous>, transform_indices = @transform_2, window_bounds = array<i64: 4, 10>}, {pipeline_mode = #tpu.pipeline_mode<synchronous>, transform_indices = @transform_3, window_bounds = array<i64: 1, 10>}, {pipeline_mode = #tpu.pipeline_mode<synchronous>, transform_indices = @transform_4, window_bounds = array<i64: 10, 256>}]} {
    %c0_i32 = arith.constant 0 : i32
    %0 = arith.cmpi eq, %arg0, %c0_i32 : i32
    %1 = arith.extui %0 : i1 to i32
    %c0_i32_0 = arith.constant 0 : i32
    %2 = arith.cmpi ne, %1, %c0_i32_0 : i32
    scf.if %2 {
      %cst_15 = arith.constant 0.000000e+00 : f32
      %19 = vector.broadcast %cst_15 : f32 to vector<10x256xf32>
      %c0_16 = arith.constant 0 : index
      %c0_17 = arith.constant 0 : index
      %20 = vector.load %arg6[%c0_16, %c0_17] : memref<10x256xf32, #tpu.memory_space<vmem>>, vector<10x256xf32>
      tpu.vector_store %arg6[%c0_16, %c0_17], %19 {strides = array<i32>} : memref<10x256xf32, #tpu.memory_space<vmem>>, vector<10x256xf32>,
    } else {
    }
    %c0 = arith.constant 0 : index
    %c0_1 = arith.constant 0 : index
    %3 = vector.load %arg1[%c0, %c0_1] : memref<16x256xbf16, #tpu.memory_space<vmem>>, vector<16x256xbf16>
    %c0_2 = arith.constant 0 : index
    %c0_3 = arith.constant 0 : index
    %4 = vector.load %arg2[%c0_2, %c0_3] : memref<256x4xbf16, #tpu.memory_space<vmem>>, vector<256x4xbf16>
    %cst = arith.constant dense<0.000000e+00> : vector<16x4xf32>
    %5 = tpu.matmul %3, %4, %cst {dimension_numbers = #tpu.dot_dimension_numbers<[1], [0], [0], [1], [0, 0, 1, 1], [], []>} : vector<16x256xbf16>, vector<256x4xbf16>, vector<16x4xf32> -> vector<16x4xf32>
    %c0_4 = arith.constant 0 : index
    %c0_5 = arith.constant 0 : index
    %6 = vector.load %arg3[%c0_4, %c0_5] : memref<4x10xf32, #tpu.memory_space<vmem>>, vector<4x10xf32>
    %cst_6 = arith.constant dense<0.000000e+00> : vector<16x10xf32>
    %7 = tpu.matmul %5, %6, %cst_6 {dimension_numbers = #tpu.dot_dimension_numbers<[1], [0], [0], [1], [0, 0, 1, 1], [], []>} : vector<16x4xf32>, vector<4x10xf32>, vector<16x10xf32> -> vector<16x10xf32>
    %c0_7 = arith.constant 0 : index
    %c0_8 = arith.constant 0 : index
    %8 = vector.load %arg4[%c0_7, %c0_8] : memref<1x10xf32, #tpu.memory_space<vmem>>, vector<1x10xf32>
    %9 = vector.broadcast %8 : vector<1x10xf32> to vector<16x10xf32>
    %10 = arith.addf %7, %9 : vector<16x10xf32>
    %c0_9 = arith.constant 0 : index
    %c0_10 = arith.constant 0 : index
    %11 = vector.load %arg6[%c0_9, %c0_10] : memref<10x256xf32, #tpu.memory_space<vmem>>, vector<10x256xf32>
    %12 = arith.truncf %10 : vector<16x10xf32> to vector<16x10xbf16>
    %cst_11 = arith.constant dense<0.000000e+00> : vector<10x256xf32>
    %13 = tpu.matmul %12, %3, %cst_11 {dimension_numbers = #tpu.dot_dimension_numbers<[0], [0], [1], [1], [0, 1, 1, 1], [], []>} : vector<16x10xbf16>, vector<16x256xbf16>, vector<10x256xf32> -> vector<10x256xf32>
    %14 = arith.addf %11, %13 : vector<10x256xf32>
    %c0_12 = arith.constant 0 : index
    %c0_13 = arith.constant 0 : index
    %15 = vector.load %arg6[%c0_12, %c0_13] : memref<10x256xf32, #tpu.memory_space<vmem>>, vector<10x256xf32>
    tpu.vector_store %arg6[%c0_12, %c0_13], %14 {strides = array<i32>} : memref<10x256xf32, #tpu.memory_space<vmem>>, vector<10x256xf32>,
    %c3_i32 = arith.constant 3 : i32
    %16 = arith.cmpi eq, %arg0, %c3_i32 : i32
    %17 = arith.extui %16 : i1 to i32
    %c0_i32_14 = arith.constant 0 : i32
    %18 = arith.cmpi ne, %17, %c0_i32_14 : i32
    scf.if %18 {
      %c0_15 = arith.constant 0 : index
      %c0_16 = arith.constant 0 : index
      %19 = vector.load %arg6[%c0_15, %c0_16] : memref<10x256xf32, #tpu.memory_space<vmem>>, vector<10x256xf32>
      %cst_17 = arith.constant 0.0333333351 : f32
      %20 = vector.broadcast %cst_17 : f32 to vector<10x256xf32>
      %21 = arith.mulf %19, %20 : vector<10x256xf32>
      %c0_18 = arith.constant 0 : index
      %c0_19 = arith.constant 0 : index
      %22 = vector.load %arg5[%c0_18, %c0_19] : memref<10x256xf32, #tpu.memory_space<vmem>>, vector<10x256xf32>
      tpu.vector_store %arg5[%c0_18, %c0_19], %21 {strides = array<i32>} : memref<10x256xf32, #tpu.memory_space<vmem>>, vector<10x256xf32>,
    } else {
    }
    return
  }
  func.func @transform_0(%arg0: i32) -> (i32, i32) {
    %c0_i32 = arith.constant 0 : i32
    %c0_i32_0 = arith.constant 0 : i32
    return %arg0, %c0_i32 : i32, i32
  }
  func.func @transform_1(%arg0: i32) -> (i32, i32) {
    %c0_i32 = arith.constant 0 : i32
    %c0_i32_0 = arith.constant 0 : i32
    %c0_i32_1 = arith.constant 0 : i32
    return %c0_i32, %c0_i32_0 : i32, i32
  }
  func.func @transform_2(%arg0: i32) -> (i32, i32) {
    %c0_i32 = arith.constant 0 : i32
    %c0_i32_0 = arith.constant 0 : i32
    %c0_i32_1 = arith.constant 0 : i32
    return %c0_i32, %c0_i32_0 : i32, i32
  }
  func.func @transform_3(%arg0: i32) -> (i32, i32) {
    %c0_i32 = arith.constant 0 : i32
    %c0_i32_0 = arith.constant 0 : i32
    %c0_i32_1 = arith.constant 0 : i32
    return %c0_i32, %c0_i32_0 : i32, i32
  }
  func.func @transform_4(%arg0: i32) -> (i32, i32) {
    %c0_i32 = arith.constant 0 : i32
    %c0_i32_0 = arith.constant 0 : i32
    %c0_i32_1 = arith.constant 0 : i32
    return %c0_i32, %c0_i32_0 : i32, i32
  }
}

</mosaic_0001>

<bundles_post_ra>
// kernel: rise_forward.1
= control target key start
LH: loop header
LB: loop body
LE: loop exit
PB: predicated region body
PF: predicated region fallthrough
CT: control target
= control target key end

     0   :  { %s721_s15 = smov 0   ;;  %s810_s0 = inlined_call_operand.vmem [shape: bf16[64,256], index: 0, kind: input, shape index: {}]   ;;  %s811_s1 = inlined_call_operand.vmem [shape: bf16[256,4], index: 1, kind: input, shape index: {}]   ;;  %s812_s2 = inlined_call_operand.vmem [shape: f32[4,10], index: 2, kind: input, shape index: {}]   ;;  %s813_s3 = inlined_call_operand.vmem [shape: f32[1,10], index: 3, kind: input, shape index: {}]   ;;  %s814_s4 = inlined_call_operand.vmem [shape: f32[10,256], index: 4, kind: output, shape index: {}]  }
   0x1 LB: > { %s727_s16 = sadd.s32 4294967295, %s692_s15   ;;  %p595_p0 = scmp.ge.s32.totalorder %s692_s15, 1  ;;  %s692_s15 = sphi %s721_s15, %s14_s15  }
   0x2   : > { %p159_p1 = scmp.lt.s32.totalorder %s692_s15, 5 }
   0x4   : > { %p160_p2 = pnand %p595_p0, %p159_p1 }
   0x5   : > { %s596_s17 = sshll.u32 (!%p160_p2), %s727_s16, 1  ;;  %p599_p4 = scmp.ne.s32.totalorder (!%p160_p2), %s727_s16, 0 }
   0x6   : > { %163 = sbr.rel (%p160_p2) target bundleno = 818 (0x332), region = 36  ;;  %p182_p3 = scmp.lt.s32.totalorder (!%p160_p2), %s596_s17, 7 }
   0xd   : > { %s816_s17 = smov (!%p182_p3, %s596_s17), 7  ;;  %192 = sbr.rel (%p599_p4) target bundleno = 20 (0x14), region = 40 }
   0xe   : > { %s626_s18 = sshll.u32 %s816_s17, 3  ;;  %v694_v0 = vmov (!%p599_p4), 0.0  }
   0xf   : > { %s735_s21 = scalar_lea.vmem %s810_s0, %s626_s18  ;;  %193 = vst [vmem:[#allocation2] sm:$0xff] (!%p599_p4), %v694_v0  ;;  %194 = vst [vmem:[#allocation2 + $0x8] sm:$0xff] (!%p599_p4), %v694_v0 }
  0x10   : > { %195 = vst [vmem:[#allocation2 + $0x10] sm:$0x3] (!%p599_p4), %v694_v0  ;;  %196 = vst [vmem:[#allocation2 + $0x18] sm:$0x3] (!%p599_p4), %v694_v0 }
  0x14 PF: > { %v667_v1 = vld [vmem:[%s811_s1 + $0x40] sm:$0xff]   ;;  %v669_v3 = vld [vmem:[%s811_s1 + $0x48] sm:$0xff]   ;;  %v671_v5 = vld [vmem:[%s811_s1 + $0x50] sm:$0xff]   ;;  %vm393_vm0 = vcmask 1043456   ;;  %vm386_vm1 = vcmask 31744   ;;  %v695_v26 = vmov 0  }
  0x15   : > { %v668_v2 = vld [vmem:[%s811_s1] sm:$0xff]   ;;  %627 = vmatprep.subr.bf16.mxu0 %v667_v1  ;;  %v670_v4 = vld [vmem:[%s811_s1 + $0x8] sm:$0xff]   ;;  %v672_v6 = vld [vmem:[%s811_s1 + $0x10] sm:$0xff]   ;;  %vm493_vm2 = vcmask 130048   ;;  %p623_p5 = scmp.ne.s32.totalorder %s727_s16, 3 }
  0x16   : > { %628 = vmatpush3.bf16.msra.mxu0 %v668_v2  ;;  %v673_v7 = vld [vmem:[%s811_s1 + $0x58] sm:$0xff]   ;;  %v675_v9 = vld [vmem:[%s811_s1 + $0x60] sm:$0xff]   ;;  %v677_v11 = vld [vmem:[%s811_s1 + $0x68] sm:$0xff]  }
  0x17   : > { %629 = vmatprep.subr.bf16.mxu0 %v669_v3  ;;  %v674_v8 = vld [vmem:[%s811_s1 + $0x18] sm:$0xff]   ;;  %v676_v10 = vld [vmem:[%s811_s1 + $0x20] sm:$0xff]   ;;  %v678_v13 = vld [vmem:[%s811_s1 + $0x28] sm:$0xff]  }
  0x18   : > { %v685_v12 = vld [vmem:[%s735_s21 + $0x4] ss:$8 sps:$4 sm:$0xff]   ;;  %v679_v14 = vld [vmem:[%s811_s1 + $0x70] sm:$0xff]   ;;  %v681_v16 = vld [vmem:[%s811_s1 + $0x78] sm:$0xff]  }
  0x19   : > { %369 = vmatprep.mubr.bf16.mxu0 %v685_v12  ;;  %v680_v15 = vld [vmem:[%s811_s1 + $0x30] sm:$0xff]   ;;  %v682_v17 = vld [vmem:[%s811_s1 + $0x38] sm:$0xff]   ;;  %v683_v18 = vld [vmem:[%s735_s21] ss:$8 sps:$4 sm:$0xff]  }
  0x1a   : > { %630 = vmatpush3.bf16.msra.mxu0 %v670_v4  ;;  %v378_v19 = vld [vmem:[%s812_s2] sm:$0xf]  ;;  %v473_v35 = vld [vmem:[#allocation2 + $0x8] sm:$0xff]  ;;  %v474_v37 = vld [vmem:[#allocation2 + $0x10] sm:$0x3] }
  0x1b   : > { %631 = vmatprep.subr.bf16.mxu0 %v671_v5  ;;  %652 = vmatprep.subr.msk.mxu1 %vm393_vm0, %v378_v19  ;;  %v618_v27 = vld [vmem:[%s813_s3] ss:$0 sm:$0xff]  ;;  %v475_v40 = vld [vmem:[#allocation2 + $0x18] sm:$0x3] }
  0x1c   : > { %653 = vmatpush3.msk.msra.mxu1 %vm393_vm0, %v378_v19  ;;  %v472_v34 = vld [vmem:[#allocation2] sm:$0xff] }
  0x1d   : > { %497 = vmatprep.subr.bf16.mxu1 %v685_v12 }
  0x1e   : > { %632 = vmatpush3.bf16.msra.mxu0 %v672_v6 }
  0x1f   : > { %633 = vmatprep.subr.bf16.mxu0 %v673_v7 }
  0x22   : > { %634 = vmatpush3.bf16.msra.mxu0 %v674_v8 }
  0x23   : > { %635 = vmatprep.subr.bf16.mxu0 %v675_v9 }
  0x26   : > { %636 = vmatpush3.bf16.msra.mxu0 %v676_v10 }
  0x27   : > { %637 = vmatprep.subr.bf16.mxu0 %v677_v11 }
  0x2a   : > { %638 = vmatpush3.bf16.msra.mxu0 %v678_v13 }
  0x2b   : > { %639 = vmatprep.subr.bf16.mxu0 %v679_v14 }
  0x2e   : > { %640 = vmatpush3.bf16.msra.mxu0 %v680_v15 }
  0x2f   : > { %641 = vmatprep.subr.bf16.mxu0 %v681_v16 }
  0x32   : > { %642 = vmatpush3.bf16.msra.mxu0 %v682_v17 }
  0x35   : > { %370 = vmatmul.mubr.bf16.vlgmr.msra.gmra.mrb[0].mxu0 %v683_v18 }
 0x108   : > { %v643_v20 = vpop.f32.mrb[0].mxu0 }
 0x109   : > { %v644_v21 = vpop.f32.mrb[1].mxu0 }
 0x10a   : > { %v645_v22 = vadd.f32 %v644_v21, %v643_v20  ;;  %v646_v23 = vpop.f32.mrb[2].mxu0 }
 0x10b   : > { %v647_v24 = vpop.f32.mrb[3].mxu0 }
 0x10c   : > { %v648_v25 = vadd.f32 %v647_v24, %v646_v23  ;;  %654 = vmatprep.mubr.msk.f32.mxu1 %vm386_vm1, %v645_v22 }
 0x10e   : > { %655 = vmatmul.mubr.msk.f32.vlgmr.msra.gmra.mrb[0].mxu1 %vm386_vm1, %v648_v25 }
 0x10f   : > { %498 = vmatpush1.bf16.msra.mxu1 %v683_v18  ;;  %529 = vmatprep.mubr.bf16.mxu1 %v695_v26 }
 0x1e1   : > { %v656_v28 = vpop.f32.mrb[0].mxu1 }
 0x1e2   : > { %v469_v29 = vadd.f32 %v656_v28, %v618_v27  ;;  %v463_v30 = vpop.f32.mrb[1].mxu1 }
 0x1e3   : > { %v464_v31 = vadd.f32 %v618_v27, %v463_v30 }
 0x1e5   : > { %v476_v32 = vpack.c.bf16 %v469_v29, %v464_v31 }
 0x1e7   : > { %477 = vxpose.xlu0.c.b16.start.end [1/1] (short) (narrow) %v476_v32, 16 }
 0x24d   : > { %v485_v33 = vpop.trf.xlu0 }
 0x24e   : > { %622 = vmatmul.mubr.msk.bf16.vlgmr.msra.gmra.mrb[4].mxu1 %vm493_vm2, %v485_v33 }
 0x321   : > { %v531_v36 = vpop.f32.mrb[4].mxu1  ;;  %551 = sbr.rel (%p623_p5) target bundleno = 818 (0x332), region = 44 }
 0x322   : > { %v540_v38 = vadd.f32 %v531_v36, %v472_v34  ;;  %v533_v39 = vpop.f32.mrb[5].mxu1 }
 0x323   : > { %v541_v41 = vadd.f32 %v533_v39, %v473_v35  ;;  %v535_v42 = vpop.f32.mrb[6].mxu1 }
 0x324   : > { %544 = vst [vmem:[#allocation2] sm:$0xff] %v540_v38  ;;  %v542_v43 = vadd.f32 %v535_v42, %v474_v37  ;;  %v537_v44 = vpop.f32.mrb[7].mxu1 }
 0x325   : > { %545 = vst [vmem:[#allocation2 + $0x8] sm:$0xff] %v541_v41  ;;  %v543_v45 = vadd.f32 %v537_v44, %v475_v40 }
 0x326   : > { %546 = vst [vmem:[#allocation2 + $0x10] sm:$0x3] %v542_v43 }
 0x327   : > { %547 = vst [vmem:[#allocation2 + $0x18] sm:$0x3] %v543_v45 }
 0x32b   : > { %v552_v46 = vld [vmem:[#allocation2] sm:$0xff] }
 0x32c   : > { %v553_v47 = vld [vmem:[#allocation2 + $0x8] sm:$0xff]  ;;  %v556_v49 = vmul.f32 0.033333335, %v552_v46 }
 0x32d   : > { %v554_v48 = vld [vmem:[#allocation2 + $0x10] sm:$0x3]  ;;  %v557_v50 = vmul.f32 0.033333335, %v553_v47 }
 0x32e   : > { %v558_v51 = vmul.f32 0.033333335, %v554_v48  ;;  %v555_v52 = vld [vmem:[#allocation2 + $0x18] sm:$0x3]  ;;  %560 = vst [vmem:[%s814_s4] sm:$0xff] %v556_v49 }
 0x32f   : > { %561 = vst [vmem:[%s814_s4 + $0x8] sm:$0xff] %v557_v50  ;;  %v559_v53 = vmul.f32 0.033333335, %v555_v52 }
 0x330   : > { %562 = vst [vmem:[%s814_s4 + $0x10] sm:$0x3] %v558_v51 }
 0x331   : > { %563 = vst [vmem:[%s814_s4 + $0x18] sm:$0x3] %v559_v53 }
 0x332 PF: > { %s14_s15 = sadd.s32 1, %s692_s15  }
 0x333   : > { %p11_p6 = scmp.ge.s32.totalorder %s14_s15, 6  }
 0x335   :  { %13 = sbr.rel (!%p11_p6) target bundleno = 1 (0x1), region = 70 }

</bundles_post_ra>
